<compile_context>
chip_gen: v7x
topology: tpu7x:2x2x1
jax: 0.10.0
libtpu: 0.0.40
codegen_flags: <defaults>
</compile_context>

<pallas_src>
import functools

import numpy as np
import jax
import jax.numpy as jnp
from jax.experimental import pallas as pl
from jax.experimental.pallas import tpu as pltpu

LANE_WIDTH = 1024     # lane-dense row width (multiple of 128)
BLOCK_ROWS = 512      # 512 x 1024 x 4B = 2 MiB/block; 8 MiB double-buffered in+out
SUB_ROWS = 8          # one f32 sublane strip (vreg-resident unit)


def _interp_kernel(xp_ref, slope_ref, icpt_ref, x_ref, o_ref):
    """Piecewise-linear evaluation: out = slope[seg] * x + intercept[seg].

    xp_ref:    (n,)   f32 SMEM knot positions (sorted, n >= 2)
    slope_ref: (n-1,) f32 SMEM per-segment slopes      (precomputed on host)
    icpt_ref:  (n-1,) f32 SMEM per-segment intercepts  (precomputed on host)
    x_ref/o_ref: (br, w) f32 VMEM tiles of the flattened energies vector.

    Fused searchsorted(side='left') + gather realised as a select scan:
    segment = clip(count(xp < x) - 1, 0, n-2).  The strict '<' preserves the
    torch.searchsorted semantics at query points exactly equal to a knot.
    """
    n = xp_ref.shape[0]
    br, w = x_ref.shape

    def eval_strip(x):
        # Start in segment 0 (covers extrapolation below xp[0]); loop only
        # runs to segment n-2 (covers extrapolation above xp[-1]).
        a = jnp.broadcast_to(slope_ref[0], x.shape)
        b = jnp.broadcast_to(icpt_ref[0], x.shape)
        for j in range(1, n - 1):                 # compile-time unrolled knots
            sel = xp_ref[j] < x
            a = jnp.where(sel, slope_ref[j], a)
            b = jnp.where(sel, icpt_ref[j], b)
        # TODO(synk): if tighter than ~1e-4 accuracy is ever needed, select
        # (slope, xp_j, fp_j) and evaluate fp_j + slope*(x - xp_j) instead of
        # the intercept form (avoids cancellation when |slope*xp| >> |fp|).
        return a * x + b

    if br % SUB_ROWS == 0 and br > SUB_ROWS:
        # Register-blocked scan: each (8, w) strip keeps x/a/b in vregs across
        # the entire knot chain instead of round-tripping full-tile
        # intermediates through VMEM (ld/st slots) every segment.
        @pl.loop(0, br // SUB_ROWS)
        def _(s):
            r = pl.multiple_of(s * SUB_ROWS, SUB_ROWS)
            o_ref[pl.ds(r, SUB_ROWS), :] = eval_strip(x_ref[pl.ds(r, SUB_ROWS), :])
    else:
        # Small blocks (<= 8 rows) are already a single vreg strip.
        o_ref[...] = eval_strip(x_ref[...])


def _choose_block_rows(rows, block_rows):
    """Row-block size: multiple of 8, capped by `block_rows`, and chosen so the
    grid has >= 2 steps whenever rows > 8 (v7x has 2 TensorCores; a single
    grid step would leave one idle)."""
    if rows <= SUB_ROWS:
        return rows
    half = (rows // 2 // SUB_ROWS) * SUB_ROWS
    return max(SUB_ROWS, min(block_rows, half))


@functools.partial(jax.jit, static_argnames=("lane_width", "block_rows"))
def _interp_precomputed(x, xp, slope, intercept, *, lane_width=LANE_WIDTH,
                        block_rows=BLOCK_ROWS):
    """Piecewise-linear eval of flat `x` against precomputed per-segment
    slope/intercept.  Pad/slice only materialize for unaligned sizes and are
    fused into the same jitted executable as the kernel."""
    x = x.reshape(-1).astype(jnp.float32)
    e = x.shape[0]

    # Lane-dense (rows, w) layout with w a multiple of 128.
    w = lane_width if e >= lane_width else max(128, ((e + 127) // 128) * 128)
    pad = (-e) % w                       # static Python int under jit
    if pad:
        x = jnp.pad(x, (0, pad))
    rows = (e + pad) // w
    x2d = x.reshape(rows, w)

    br = _choose_block_rows(rows, block_rows)
    grid = (pl.cdiv(rows, br),)          # ragged tail block: masked edge stores

    out = pl.pallas_call(
        _interp_kernel,
        out_shape=jax.ShapeDtypeStruct((rows, w), jnp.float32),
        grid=grid,
        in_specs=[
            pl.BlockSpec(memory_space=pltpu.MemorySpace.SMEM),   # xp knots
            pl.BlockSpec(memory_space=pltpu.MemorySpace.SMEM),   # slopes
            pl.BlockSpec(memory_space=pltpu.MemorySpace.SMEM),   # intercepts
            pl.BlockSpec((br, w), lambda i: (i, 0)),             # energies tile
        ],
        out_specs=pl.BlockSpec((br, w), lambda i: (i, 0)),
        compiler_params=pltpu.CompilerParams(
            dimension_semantics=("parallel",)),
    )(xp, slope, intercept, x2d)

    flat = out.reshape(-1)
    return flat[:e] if pad else flat


def pallas_linear_interp(x, xp, fp, *, lane_width=LANE_WIDTH, block_rows=BLOCK_ROWS):
    """Linear interpolation of 1-D `x` against knots (xp, fp) on TPU."""
    x = jnp.asarray(x, jnp.float32)
    xp = jnp.asarray(xp, jnp.float32)
    fp = jnp.asarray(fp, jnp.float32)
    if xp.shape[0] < 2:
        raise ValueError("linear_interp requires at least 2 knots (xp).")
    # Per-segment slope / intercept so the kernel is a divide-free select scan
    # + multiply-add.  Duplicate knots yield inf/NaN slopes, matching torch.
    slope = (fp[1:] - fp[:-1]) / (xp[1:] - xp[:-1])
    intercept = fp[:-1] - slope * xp[:-1]
    return _interp_precomputed(x, xp, slope, intercept,
                               lane_width=lane_width, block_rows=block_rows)


def _normalize_tuple(t):
    """JAX mirror of normalize_tuple_as_parameter (glue, not kernel work)."""
    init, lo, hi = t
    if init is None:
        raise ValueError("initial value cannot be None")
    lo = init if lo is None else lo
    hi = init if hi is None else hi
    if lo == hi:
        return (jnp.float32(1.0), lo, hi)
    return (jnp.float32((init - lo) / (hi - lo)), lo, hi)


class BaseSpecModelPallas:
    """JAX/Pallas port of Base_Spec_Model (forward path is the kernel)."""

    _count = 0

    def __init__(self, params_list=()):
        type(self)._count += 1
        self.prefix = f"{type(self).__name__}_{type(self)._count}"
        self._params_list = []
        for params in params_list:
            new_params = {}
            for key, value in params.items():
                if isinstance(value, tuple):
                    new_params[key] = _normalize_tuple(value)
                else:
                    new_params[key] = value
            self._params_list.append(new_params)
        self.estimates = dict(self._params_list[0]) if self._params_list else {}
        # TODO(synk): set_params/get_params autograd clamp bookkeeping is plain
        # parameter glue (no tensor math) and is intentionally not a kernel.

    def set_spectrum(self, energies, sp):
        xp = jnp.asarray(energies, jnp.float32)
        fp = jnp.asarray(sp, jnp.float32)
        if xp.shape[0] < 2:
            raise ValueError("set_spectrum requires at least 2 energy knots.")
        self.ref_sp_energies = xp
        self.ref_sp = fp
        # Cache per-segment slope / intercept once so forward() is a single
        # jitted dispatch (no tiny per-call XLA ops on the knot arrays).
        slope = (fp[1:] - fp[:-1]) / (xp[1:] - xp[:-1])
        intercept = fp[:-1] - slope * xp[:-1]
        self._slope = jax.block_until_ready(slope)
        self._intercept = jax.block_until_ready(intercept)

    def forward(self, energies):
        energies = jnp.asarray(energies, jnp.float32)
        if hasattr(self, "ref_sp_energies") and hasattr(self, "ref_sp"):
            return _interp_precomputed(energies, self.ref_sp_energies,
                                       self._slope, self._intercept)
        print("ref_sp_energies or ref_sp is not set.")
        return jnp.ones((energies.shape[0],), jnp.float32)


def _numpy_reference(x, xp, fp):
    """Exact replica of torch linear_interp semantics for verification."""
    idx = np.searchsorted(xp, x, side="left") - 1
    idx = np.clip(idx, 0, len(xp) - 2)
    slope = (fp[idx + 1] - fp[idx]) / (xp[idx + 1] - xp[idx])
    return fp[idx] + slope * (x - xp[idx])


if __name__ == "__main__":
    key = jax.random.PRNGKey(0)
    k1, k2, k3, k4 = jax.random.split(key, 4)

    # Deterministic reference spectrum (16 energy knots, keV).
    n_knots = 16
    ref_energies = jnp.linspace(10.0, 150.0, n_knots, dtype=jnp.float32)
    ref_sp = jax.random.uniform(k1, (n_knots,), jnp.float32, 0.1, 5.0)

    model = BaseSpecModelPallas(params_list=[{"voltage": (80.0, 30.0, 160.0)}])
    model.set_spectrum(ref_energies, ref_sp)

    xp64 = np.asarray(ref_energies, np.float64)
    fp64 = np.asarray(ref_sp, np.float64)

    def check(out, x):
        ref = _numpy_reference(np.asarray(x, np.float64), xp64, fp64)
        np.testing.assert_allclose(np.asarray(out), ref, rtol=1e-4, atol=1e-4)

    # Case 1: small query vector (includes out-of-range values -> extrapolation);
    # single padded block, <= 8 rows -> whole-ref strip path.
    energies1 = jax.random.uniform(k2, (300,), jnp.float32, 5.0, 160.0)
    check(jax.block_until_ready(model.forward(energies1)), energies1)
    # Second call reuses the cached jit executable + cached slopes/intercepts.
    check(jax.block_until_ready(model.forward(energies1)), energies1)

    # Case 2: width-aligned input (no pad/slice copies); >= 2 parallel grid
    # steps and a register-blocked strip loop with a ragged tail block.
    energies2 = jax.random.uniform(k3, (33 * 1024,), jnp.float32, 5.0, 160.0)
    check(jax.block_until_ready(model.forward(energies2)), energies2)

    # Case 3: unaligned larger input through the public helper -> exercises
    # pad + multi-strip pl.loop + partial tail block (masked edge stores).
    energies3 = jax.random.uniform(k4, (65 * 1024 + 17,), jnp.float32, 5.0, 160.0)
    check(jax.block_until_ready(
        pallas_linear_interp(energies3, ref_energies, ref_sp)), energies3)

    # Also exercise the "no spectrum set" branch (plain JAX fallback).
    fallback = BaseSpecModelPallas().forward(energies1)
    assert fallback.shape == (300,) and bool(jnp.all(fallback == 1.0))

    print("KERNEL_OK")
</pallas_src>

<mosaic_0001>
module attributes {stable_mosaic.version = 11 : i64} {
  func.func @_interp_kernel(%arg0: i32, %arg1: memref<16xf32, #tpu.memory_space<smem>>, %arg2: memref<15xf32, #tpu.memory_space<smem>>, %arg3: memref<15xf32, #tpu.memory_space<smem>>, %arg4: memref<1x384xf32, #tpu.memory_space<vmem>>, %arg5: memref<1x384xf32, #tpu.memory_space<vmem>>) attributes {dimension_semantics = [#tpu.dimension_semantics<parallel>], iteration_bounds = array<i64: 1>, scalar_prefetch = 0 : i64, scratch_operands = 0 : i64, tpu.core_type = #tpu.core_type<tc>, window_params = [{transform_indices = @transform_0, window_bounds = array<i64: 16>}, {transform_indices = @transform_1, window_bounds = array<i64: 15>}, {transform_indices = @transform_2, window_bounds = array<i64: 15>}, {transform_indices = @transform_3, window_bounds = array<i64: 1, 384>}, {transform_indices = @transform_4, window_bounds = array<i64: 1, 384>}]} {
    %c0 = arith.constant 0 : index
    %c0_0 = arith.constant 0 : index
    %0 = vector.load %arg4[%c0, %c0_0] : memref<1x384xf32, #tpu.memory_space<vmem>>, vector<1x384xf32>
    %c0_1 = arith.constant 0 : index
    %1 = memref.load %arg2[%c0_1] : memref<15xf32, #tpu.memory_space<smem>>
    %2 = vector.broadcast %1 : f32 to vector<1x384xf32>
    %c0_2 = arith.constant 0 : index
    %3 = memref.load %arg3[%c0_2] : memref<15xf32, #tpu.memory_space<smem>>
    %4 = vector.broadcast %3 : f32 to vector<1x384xf32>
    %c1 = arith.constant 1 : index
    %5 = memref.load %arg1[%c1] : memref<16xf32, #tpu.memory_space<smem>>
    %6 = vector.broadcast %5 : f32 to vector<1x384xf32>
    %7 = arith.cmpf olt, %6, %0 : vector<1x384xf32>
    %c1_3 = arith.constant 1 : index
    %8 = memref.load %arg2[%c1_3] : memref<15xf32, #tpu.memory_space<smem>>
    %9 = vector.broadcast %8 : f32 to vector<1x384xf32>
    %10 = arith.select %7, %9, %2 : vector<1x384xi1>, vector<1x384xf32>
    %c1_4 = arith.constant 1 : index
    %11 = memref.load %arg3[%c1_4] : memref<15xf32, #tpu.memory_space<smem>>
    %12 = vector.broadcast %11 : f32 to vector<1x384xf32>
    %13 = arith.select %7, %12, %4 : vector<1x384xi1>, vector<1x384xf32>
    %c2 = arith.constant 2 : index
    %14 = memref.load %arg1[%c2] : memref<16xf32, #tpu.memory_space<smem>>
    %15 = vector.broadcast %14 : f32 to vector<1x384xf32>
    %16 = arith.cmpf olt, %15, %0 : vector<1x384xf32>
    %c2_5 = arith.constant 2 : index
    %17 = memref.load %arg2[%c2_5] : memref<15xf32, #tpu.memory_space<smem>>
    %18 = vector.broadcast %17 : f32 to vector<1x384xf32>
    %19 = arith.select %16, %18, %10 : vector<1x384xi1>, vector<1x384xf32>
    %c2_6 = arith.constant 2 : index
    %20 = memref.load %arg3[%c2_6] : memref<15xf32, #tpu.memory_space<smem>>
    %21 = vector.broadcast %20 : f32 to vector<1x384xf32>
    %22 = arith.select %16, %21, %13 : vector<1x384xi1>, vector<1x384xf32>
    %c3 = arith.constant 3 : index
    %23 = memref.load %arg1[%c3] : memref<16xf32, #tpu.memory_space<smem>>
    %24 = vector.broadcast %23 : f32 to vector<1x384xf32>
    %25 = arith.cmpf olt, %24, %0 : vector<1x384xf32>
    %c3_7 = arith.constant 3 : index
    %26 = memref.load %arg2[%c3_7] : memref<15xf32, #tpu.memory_space<smem>>
    %27 = vector.broadcast %26 : f32 to vector<1x384xf32>
    %28 = arith.select %25, %27, %19 : vector<1x384xi1>, vector<1x384xf32>
    %c3_8 = arith.constant 3 : index
    %29 = memref.load %arg3[%c3_8] : memref<15xf32, #tpu.memory_space<smem>>
    %30 = vector.broadcast %29 : f32 to vector<1x384xf32>
    %31 = arith.select %25, %30, %22 : vector<1x384xi1>, vector<1x384xf32>
    %c4 = arith.constant 4 : index
    %32 = memref.load %arg1[%c4] : memref<16xf32, #tpu.memory_space<smem>>
    %33 = vector.broadcast %32 : f32 to vector<1x384xf32>
    %34 = arith.cmpf olt, %33, %0 : vector<1x384xf32>
    %c4_9 = arith.constant 4 : index
    %35 = memref.load %arg2[%c4_9] : memref<15xf32, #tpu.memory_space<smem>>
    %36 = vector.broadcast %35 : f32 to vector<1x384xf32>
    %37 = arith.select %34, %36, %28 : vector<1x384xi1>, vector<1x384xf32>
    %c4_10 = arith.constant 4 : index
    %38 = memref.load %arg3[%c4_10] : memref<15xf32, #tpu.memory_space<smem>>
    %39 = vector.broadcast %38 : f32 to vector<1x384xf32>
    %40 = arith.select %34, %39, %31 : vector<1x384xi1>, vector<1x384xf32>
    %c5 = arith.constant 5 : index
    %41 = memref.load %arg1[%c5] : memref<16xf32, #tpu.memory_space<smem>>
    %42 = vector.broadcast %41 : f32 to vector<1x384xf32>
    %43 = arith.cmpf olt, %42, %0 : vector<1x384xf32>
    %c5_11 = arith.constant 5 : index
    %44 = memref.load %arg2[%c5_11] : memref<15xf32, #tpu.memory_space<smem>>
    %45 = vector.broadcast %44 : f32 to vector<1x384xf32>
    %46 = arith.select %43, %45, %37 : vector<1x384xi1>, vector<1x384xf32>
    %c5_12 = arith.constant 5 : index
    %47 = memref.load %arg3[%c5_12] : memref<15xf32, #tpu.memory_space<smem>>
    %48 = vector.broadcast %47 : f32 to vector<1x384xf32>
    %49 = arith.select %43, %48, %40 : vector<1x384xi1>, vector<1x384xf32>
    %c6 = arith.constant 6 : index
    %50 = memref.load %arg1[%c6] : memref<16xf32, #tpu.memory_space<smem>>
    %51 = vector.broadcast %50 : f32 to vector<1x384xf32>
    %52 = arith.cmpf olt, %51, %0 : vector<1x384xf32>
    %c6_13 = arith.constant 6 : index
    %53 = memref.load %arg2[%c6_13] : memref<15xf32, #tpu.memory_space<smem>>
    %54 = vector.broadcast %53 : f32 to vector<1x384xf32>
    %55 = arith.select %52, %54, %46 : vector<1x384xi1>, vector<1x384xf32>
    %c6_14 = arith.constant 6 : index
    %56 = memref.load %arg3[%c6_14] : memref<15xf32, #tpu.memory_space<smem>>
    %57 = vector.broadcast %56 : f32 to vector<1x384xf32>
    %58 = arith.select %52, %57, %49 : vector<1x384xi1>, vector<1x384xf32>
    %c7 = arith.constant 7 : index
    %59 = memref.load %arg1[%c7] : memref<16xf32, #tpu.memory_space<smem>>
    %60 = vector.broadcast %59 : f32 to vector<1x384xf32>
    %61 = arith.cmpf olt, %60, %0 : vector<1x384xf32>
    %c7_15 = arith.constant 7 : index
    %62 = memref.load %arg2[%c7_15] : memref<15xf32, #tpu.memory_space<smem>>
    %63 = vector.broadcast %62 : f32 to vector<1x384xf32>
    %64 = arith.select %61, %63, %55 : vector<1x384xi1>, vector<1x384xf32>
    %c7_16 = arith.constant 7 : index
    %65 = memref.load %arg3[%c7_16] : memref<15xf32, #tpu.memory_space<smem>>
    %66 = vector.broadcast %65 : f32 to vector<1x384xf32>
    %67 = arith.select %61, %66, %58 : vector<1x384xi1>, vector<1x384xf32>
    %c8 = arith.constant 8 : index
    %68 = memref.load %arg1[%c8] : memref<16xf32, #tpu.memory_space<smem>>
    %69 = vector.broadcast %68 : f32 to vector<1x384xf32>
    %70 = arith.cmpf olt, %69, %0 : vector<1x384xf32>
    %c8_17 = arith.constant 8 : index
    %71 = memref.load %arg2[%c8_17] : memref<15xf32, #tpu.memory_space<smem>>
    %72 = vector.broadcast %71 : f32 to vector<1x384xf32>
    %73 = arith.select %70, %72, %64 : vector<1x384xi1>, vector<1x384xf32>
    %c8_18 = arith.constant 8 : index
    %74 = memref.load %arg3[%c8_18] : memref<15xf32, #tpu.memory_space<smem>>
    %75 = vector.broadcast %74 : f32 to vector<1x384xf32>
    %76 = arith.select %70, %75, %67 : vector<1x384xi1>, vector<1x384xf32>
    %c9 = arith.constant 9 : index
    %77 = memref.load %arg1[%c9] : memref<16xf32, #tpu.memory_space<smem>>
    %78 = vector.broadcast %77 : f32 to vector<1x384xf32>
    %79 = arith.cmpf olt, %78, %0 : vector<1x384xf32>
    %c9_19 = arith.constant 9 : index
    %80 = memref.load %arg2[%c9_19] : memref<15xf32, #tpu.memory_space<smem>>
    %81 = vector.broadcast %80 : f32 to vector<1x384xf32>
    %82 = arith.select %79, %81, %73 : vector<1x384xi1>, vector<1x384xf32>
    %c9_20 = arith.constant 9 : index
    %83 = memref.load %arg3[%c9_20] : memref<15xf32, #tpu.memory_space<smem>>
    %84 = vector.broadcast %83 : f32 to vector<1x384xf32>
    %85 = arith.select %79, %84, %76 : vector<1x384xi1>, vector<1x384xf32>
    %c10 = arith.constant 10 : index
    %86 = memref.load %arg1[%c10] : memref<16xf32, #tpu.memory_space<smem>>
    %87 = vector.broadcast %86 : f32 to vector<1x384xf32>
    %88 = arith.cmpf olt, %87, %0 : vector<1x384xf32>
    %c10_21 = arith.constant 10 : index
    %89 = memref.load %arg2[%c10_21] : memref<15xf32, #tpu.memory_space<smem>>
    %90 = vector.broadcast %89 : f32 to vector<1x384xf32>
    %91 = arith.select %88, %90, %82 : vector<1x384xi1>, vector<1x384xf32>
    %c10_22 = arith.constant 10 : index
    %92 = memref.load %arg3[%c10_22] : memref<15xf32, #tpu.memory_space<smem>>
    %93 = vector.broadcast %92 : f32 to vector<1x384xf32>
    %94 = arith.select %88, %93, %85 : vector<1x384xi1>, vector<1x384xf32>
    %c11 = arith.constant 11 : index
    %95 = memref.load %arg1[%c11] : memref<16xf32, #tpu.memory_space<smem>>
    %96 = vector.broadcast %95 : f32 to vector<1x384xf32>
    %97 = arith.cmpf olt, %96, %0 : vector<1x384xf32>
    %c11_23 = arith.constant 11 : index
    %98 = memref.load %arg2[%c11_23] : memref<15xf32, #tpu.memory_space<smem>>
    %99 = vector.broadcast %98 : f32 to vector<1x384xf32>
    %100 = arith.select %97, %99, %91 : vector<1x384xi1>, vector<1x384xf32>
    %c11_24 = arith.constant 11 : index
    %101 = memref.load %arg3[%c11_24] : memref<15xf32, #tpu.memory_space<smem>>
    %102 = vector.broadcast %101 : f32 to vector<1x384xf32>
    %103 = arith.select %97, %102, %94 : vector<1x384xi1>, vector<1x384xf32>
    %c12 = arith.constant 12 : index
    %104 = memref.load %arg1[%c12] : memref<16xf32, #tpu.memory_space<smem>>
    %105 = vector.broadcast %104 : f32 to vector<1x384xf32>
    %106 = arith.cmpf olt, %105, %0 : vector<1x384xf32>
    %c12_25 = arith.constant 12 : index
    %107 = memref.load %arg2[%c12_25] : memref<15xf32, #tpu.memory_space<smem>>
    %108 = vector.broadcast %107 : f32 to vector<1x384xf32>
    %109 = arith.select %106, %108, %100 : vector<1x384xi1>, vector<1x384xf32>
    %c12_26 = arith.constant 12 : index
    %110 = memref.load %arg3[%c12_26] : memref<15xf32, #tpu.memory_space<smem>>
    %111 = vector.broadcast %110 : f32 to vector<1x384xf32>
    %112 = arith.select %106, %111, %103 : vector<1x384xi1>, vector<1x384xf32>
    %c13 = arith.constant 13 : index
    %113 = memref.load %arg1[%c13] : memref<16xf32, #tpu.memory_space<smem>>
    %114 = vector.broadcast %113 : f32 to vector<1x384xf32>
    %115 = arith.cmpf olt, %114, %0 : vector<1x384xf32>
    %c13_27 = arith.constant 13 : index
    %116 = memref.load %arg2[%c13_27] : memref<15xf32, #tpu.memory_space<smem>>
    %117 = vector.broadcast %116 : f32 to vector<1x384xf32>
    %118 = arith.select %115, %117, %109 : vector<1x384xi1>, vector<1x384xf32>
    %c13_28 = arith.constant 13 : index
    %119 = memref.load %arg3[%c13_28] : memref<15xf32, #tpu.memory_space<smem>>
    %120 = vector.broadcast %119 : f32 to vector<1x384xf32>
    %121 = arith.select %115, %120, %112 : vector<1x384xi1>, vector<1x384xf32>
    %c14 = arith.constant 14 : index
    %122 = memref.load %arg1[%c14] : memref<16xf32, #tpu.memory_space<smem>>
    %123 = vector.broadcast %122 : f32 to vector<1x384xf32>
    %124 = arith.cmpf olt, %123, %0 : vector<1x384xf32>
    %c14_29 = arith.constant 14 : index
    %125 = memref.load %arg2[%c14_29] : memref<15xf32, #tpu.memory_space<smem>>
    %126 = vector.broadcast %125 : f32 to vector<1x384xf32>
    %127 = arith.select %124, %126, %118 : vector<1x384xi1>, vector<1x384xf32>
    %c14_30 = arith.constant 14 : index
    %128 = memref.load %arg3[%c14_30] : memref<15xf32, #tpu.memory_space<smem>>
    %129 = vector.broadcast %128 : f32 to vector<1x384xf32>
    %130 = arith.select %124, %129, %121 : vector<1x384xi1>, vector<1x384xf32>
    %131 = arith.mulf %127, %0 : vector<1x384xf32>
    %132 = arith.addf %131, %130 : vector<1x384xf32>
    %c0_31 = arith.constant 0 : index
    %c0_32 = arith.constant 0 : index
    %133 = vector.load %arg5[%c0_31, %c0_32] : memref<1x384xf32, #tpu.memory_space<vmem>>, vector<1x384xf32>
    tpu.vector_store %arg5[%c0_31, %c0_32], %132 {strides = array<i32>} : memref<1x384xf32, #tpu.memory_space<vmem>>, vector<1x384xf32>,
    return
  }
  func.func @transform_0(%arg0: i32) -> i32 {
    %c0_i32 = arith.constant 0 : i32
    %c0_i32_0 = arith.constant 0 : i32
    return %c0_i32 : i32
  }
  func.func @transform_1(%arg0: i32) -> i32 {
    %c0_i32 = arith.constant 0 : i32
    %c0_i32_0 = arith.constant 0 : i32
    return %c0_i32 : i32
  }
  func.func @transform_2(%arg0: i32) -> i32 {
    %c0_i32 = arith.constant 0 : i32
    %c0_i32_0 = arith.constant 0 : i32
    return %c0_i32 : i32
  }
  func.func @transform_3(%arg0: i32) -> (i32, i32) {
    %c0_i32 = arith.constant 0 : i32
    %c0_i32_0 = arith.constant 0 : i32
    return %arg0, %c0_i32 : i32, i32
  }
  func.func @transform_4(%arg0: i32) -> (i32, i32) {
    %c0_i32 = arith.constant 0 : i32
    %c0_i32_0 = arith.constant 0 : i32
    return %arg0, %c0_i32 : i32, i32
  }
}

</mosaic_0001>

<bundles_post_ra>
// kernel: _interp_precomputed.1
= control target key start
LH: loop header
LB: loop body
LE: loop exit
PB: predicated region body
PF: predicated region fallthrough
CT: control target
= control target key end

     0   :  { %9 = vsyncpa [#allocation3], 0  ;;  %s442_s0 = inlined_call_operand.vmem [shape: f32[16], index: 0, kind: input, shape index: {}]   ;;  %s443_s1 = inlined_call_operand.vmem [shape: f32[15], index: 1, kind: input, shape index: {}]   ;;  %s444_s2 = inlined_call_operand.vmem [shape: f32[15], index: 2, kind: input, shape index: {}]   ;;  %s445_s3 = inlined_call_operand.vmem [shape: f32[1,384], index: 3, kind: input, shape index: {}]   ;;  %s446_s4 = inlined_call_operand.vmem [shape: f32[1,384], index: 4, kind: output, shape index: {}]  }
   0x1   :  { %10 = vsyncpa [#allocation5], 0  ;;  %s27_s17 = sshll.u32 %s443_s1, 4  ;;  %s17_s20 = sshll.u32 %s442_s0, 4  ;;  %s28_s17 = int_to_ptr.vmem [resolvable:$true] %s27_s17  ;;  %s18_s20 = int_to_ptr.vmem [resolvable:$true] %s17_s20 }
   0x2   :  { %s242_s21 = scalar_lea.vmem %s28_s17, 16  ;;  %p247_p1 = scmp.lt.s32.totalorder %s28_s17, %s28_s17 }
   0x3   :  { %p243_p0 = scmp.ne.s32.totalorder %s28_s17, %s242_s21  ;;  %p248_p2 = scmp.lt.s32.totalorder %s242_s21, %s242_s21 }
   0x5   :  { %p249_p3 = por %p248_p2, %p247_p1 }
   0x7   :  { %p250_p4 = pnand %p249_p3, %p243_p0 }
   0x9   :  { %253 = shalt.err (!%p250_p4)
}
   0xa   :  { %s282_s22 = smov [#allocation4]   ;;  %s254_s23 = scalar_lea.vmem %s18_s20, 16 }
   0xb   :  { %30 = dma.vmem_to_smem %s28_s17, 16, %s282_s22, [#allocation5]  }
   0xc   :  { %p255_p5 = scmp.ne.s32.totalorder %s18_s20, %s254_s23  ;;  %p259_p6 = scmp.lt.s32.totalorder %s18_s20, %s18_s20 }
   0xd   :  { %p260_p7 = scmp.lt.s32.totalorder %s254_s23, %s254_s23 }
   0xf   :  { %p261_p8 = por %p260_p7, %p259_p6 }
  0x11   :  { %p262_p9 = pnand %p261_p8, %p255_p5 }
  0x13   :  { %265 = shalt.err (!%p262_p9)
}
  0x14   :  { %s283_s1 = smov [#allocation2]   ;;  %s37_s25 = sshll.u32 %s444_s2, 4  ;;  %s38_s25 = int_to_ptr.vmem [resolvable:$true] %s37_s25 }
  0x15   :  { %20 = dma.vmem_to_smem %s18_s20, 16, %s283_s1, [#allocation3]  }
  0x16   :  { %s266_s26 = scalar_lea.vmem %s38_s25, 16  ;;  %p271_p11 = scmp.lt.s32.totalorder %s38_s25, %s38_s25 }
  0x17   :  { %p267_p10 = scmp.ne.s32.totalorder %s38_s25, %s266_s26  ;;  %p272_p12 = scmp.lt.s32.totalorder %s266_s26, %s266_s26 }
  0x19   :  { %p273_p13 = por %p272_p12, %p271_p11 }
  0x1b   :  { %p274_p0 = pnand %p273_p13, %p267_p10 }
  0x1d   :  { %277 = shalt.err (!%p274_p0)
}
  0x1e   :  { %s284_s27 = smov [#allocation6]  }
  0x1f   :  { %40 = dma.vmem_to_smem %s38_s25, 16, %s284_s27, [#allocation5]  }
  0x20   :  { %278 = dma.done.wait [#allocation3], 16  }
  0x21   :  { %279 = vsyncadd [#allocation3], 4294967280 }
  0x22   :  { %280 = dma.done.wait [#allocation5], 32  }
  0x23   :  { %281 = vsyncadd [#allocation5], 4294967264 }
  0x24   :  { %52 = sfence }
  0x25   :  { %s54_s28 = sld [smem:[#allocation4]]  ;;  %s197_s30 = sld [smem:[#allocation2 + $0x1]]  ;;  %v328_v0 = vld [vmem:[%s445_s3] sm:$0x7]  ;;  %v186_v7 = vlaneseq }
  0x26   :  { %s56_s29 = sld [smem:[#allocation6]]  ;;  %s198_s5 = sld [smem:[#allocation4 + $0x1]] }
  0x27   :  { %s199_s2 = sld [smem:[#allocation6 + $0x1]]  ;;  %s200_s6 = sld [smem:[#allocation2 + $0x2]]  ;;  %vm188_vm14 = vcmp.lt.s32.totalorder %v186_v7, 384 }
  0x28   :  { %s201_s7 = sld [smem:[#allocation4 + $0x2]]  ;;  %s321_s9 = sld [smem:[#allocation2 + $0x3]] }
  0x29   :  { %s319_s8 = sld [smem:[#allocation6 + $0x2]]  ;;  %s323_s10 = sld [smem:[#allocation4 + $0x3]] }
  0x2a   :  { %s330_s13 = sld [smem:[#allocation6 + $0x3]]  ;;  %s332_s14 = sld [smem:[#allocation2 + $0x4]] }
  0x2b   :  { %v55_v1 = vstv %s54_s28  ;;  %s334_s15 = sld [smem:[#allocation4 + $0x4]]  ;;  %v59_v3 = vstv %s197_s30  ;;  %s338_s17 = sld [smem:[#allocation2 + $0x5]] }
  0x2c   :  { %v57_v2 = vstv %s56_s29  ;;  %s336_s16 = sld [smem:[#allocation6 + $0x4]]  ;;  %v62_v4 = vstv %s198_s5  ;;  %s340_s18 = sld [smem:[#allocation4 + $0x5]]  ;;  %vm60_vm0 = vcmp.lt.f32.partialorder %v59_v3, %v328_v0 }
  0x2d   :  { %v65_v5 = vstv %s199_s2  ;;  %v68_v6 = vstv %s200_s6  ;;  %s343_s3 = sld [smem:[#allocation6 + $0x5]]  ;;  %s345_s19 = sld [smem:[#allocation2 + $0x6]]  ;;  %v63_v8 = vsel %vm60_vm0, %v62_v4, %v55_v1 }
  0x2e   :  { %v66_v9 = vsel %vm60_vm0, %v65_v5, %v57_v2  ;;  %vm69_vm1 = vcmp.lt.f32.partialorder %v68_v6, %v328_v0  ;;  %v71_v10 = vstv %s201_s7  ;;  %s348_s20 = sld [smem:[#allocation4 + $0x6]]  ;;  %v77_v13 = vstv %s321_s9  ;;  %s355_s22 = sld [smem:[#allocation2 + $0x7]] }
  0x2f   :  { %s350_s21 = sld [smem:[#allocation6 + $0x6]]  ;;  %v72_v11 = vsel %vm69_vm1, %v71_v10, %v63_v8  ;;  %v74_v12 = vstv %s319_s8  ;;  %v80_v14 = vstv %s323_s10  ;;  %s357_s23 = sld [smem:[#allocation4 + $0x7]]  ;;  %vm78_vm2 = vcmp.lt.f32.partialorder %v77_v13, %v328_v0 }
  0x30   :  { %v75_v15 = vsel %vm69_vm1, %v74_v12, %v66_v9  ;;  %v83_v16 = vstv %s330_s13  ;;  %v86_v17 = vstv %s332_s14  ;;  %s362_s1 = sld [smem:[#allocation6 + $0x7]]  ;;  %s364_s0 = sld [smem:[#allocation2 + $0x8]]  ;;  %v81_v18 = vsel %vm78_vm2, %v80_v14, %v72_v11 }
  0x31   :  { %v84_v19 = vsel %vm78_vm2, %v83_v16, %v75_v15  ;;  %vm87_vm3 = vcmp.lt.f32.partialorder %v86_v17, %v328_v0  ;;  %v89_v20 = vstv %s334_s15  ;;  %s368_s24 = sld [smem:[#allocation4 + $0x8]]  ;;  %v95_v23 = vstv %s338_s17  ;;  %s375_s26 = sld [smem:[#allocation2 + $0x9]] }
  0x32   :  { %s370_s25 = sld [smem:[#allocation6 + $0x8]]  ;;  %v90_v21 = vsel %vm87_vm3, %v89_v20, %v81_v18  ;;  %v92_v22 = vstv %s336_s16  ;;  %v98_v24 = vstv %s340_s18  ;;  %s377_s27 = sld [smem:[#allocation4 + $0x9]]  ;;  %vm96_vm4 = vcmp.lt.f32.partialorder %v95_v23, %v328_v0 }
  0x33   :  { %v93_v25 = vsel %vm87_vm3, %v92_v22, %v84_v19  ;;  %v101_v26 = vstv %s343_s3  ;;  %v104_v27 = vstv %s345_s19  ;;  %s382_s28 = sld [smem:[#allocation6 + $0x9]]  ;;  %s384_s29 = sld [smem:[#allocation2 + $0xa]]  ;;  %v99_v28 = vsel %vm96_vm4, %v98_v24, %v90_v21 }
  0x34   :  { %v102_v29 = vsel %vm96_vm4, %v101_v26, %v93_v25  ;;  %vm105_vm5 = vcmp.lt.f32.partialorder %v104_v27, %v328_v0  ;;  %v107_v30 = vstv %s348_s20  ;;  %s388_s30 = sld [smem:[#allocation4 + $0xa]]  ;;  %v113_v33 = vstv %s355_s22  ;;  %s395_s2 = sld [smem:[#allocation2 + $0xb]] }
  0x35   :  { %s390_s5 = sld [smem:[#allocation6 + $0xa]]  ;;  %v108_v31 = vsel %vm105_vm5, %v107_v30, %v99_v28  ;;  %v110_v32 = vstv %s350_s21  ;;  %v116_v34 = vstv %s357_s23  ;;  %s397_s6 = sld [smem:[#allocation4 + $0xb]]  ;;  %vm114_vm6 = vcmp.lt.f32.partialorder %v113_v33, %v328_v0 }
  0x36   :  { %v111_v35 = vsel %vm105_vm5, %v110_v32, %v102_v29  ;;  %v119_v36 = vstv %s362_s1  ;;  %v122_v37 = vstv %s364_s0  ;;  %s402_s7 = sld [smem:[#allocation6 + $0xb]]  ;;  %s404_s8 = sld [smem:[#allocation2 + $0xc]]  ;;  %v117_v38 = vsel %vm114_vm6, %v116_v34, %v108_v31 }
  0x37   :  { %v120_v39 = vsel %vm114_vm6, %v119_v36, %v111_v35  ;;  %vm123_vm7 = vcmp.lt.f32.partialorder %v122_v37, %v328_v0  ;;  %v125_v40 = vstv %s368_s24  ;;  %s408_s9 = sld [smem:[#allocation4 + $0xc]]  ;;  %v131_v43 = vstv %s375_s26  ;;  %s415_s11 = sld [smem:[#allocation2 + $0xd]] }
  0x38   :  { %s410_s10 = sld [smem:[#allocation6 + $0xc]]  ;;  %v126_v41 = vsel %vm123_vm7, %v125_v40, %v117_v38  ;;  %v128_v42 = vstv %s370_s25  ;;  %v134_v44 = vstv %s377_s27  ;;  %s417_s12 = sld [smem:[#allocation4 + $0xd]]  ;;  %vm132_vm8 = vcmp.lt.f32.partialorder %v131_v43, %v328_v0 }
  0x39   :  { %v129_v45 = vsel %vm123_vm7, %v128_v42, %v120_v39  ;;  %v137_v46 = vstv %s382_s28  ;;  %v140_v47 = vstv %s384_s29  ;;  %s235_s13 = sld [smem:[#allocation6 + $0xd]]  ;;  %s236_s14 = sld [smem:[#allocation2 + $0xe]]  ;;  %v135_v48 = vsel %vm132_vm8, %v134_v44, %v126_v41 }
  0x3a   :  { %v138_v49 = vsel %vm132_vm8, %v137_v46, %v129_v45  ;;  %vm141_vm9 = vcmp.lt.f32.partialorder %v140_v47, %v328_v0  ;;  %v143_v50 = vstv %s388_s30  ;;  %s237_s15 = sld [smem:[#allocation4 + $0xe]]  ;;  %v149_v53 = vstv %s395_s2 }
  0x3b   :  { %s238_s16 = sld [smem:[#allocation6 + $0xe]]  ;;  %v144_v51 = vsel %vm141_vm9, %v143_v50, %v135_v48  ;;  %v146_v52 = vstv %s390_s5  ;;  %v152_v54 = vstv %s397_s6  ;;  %vm150_vm10 = vcmp.lt.f32.partialorder %v149_v53, %v328_v0 }
  0x3c   :  { %v147_v55 = vsel %vm141_vm9, %v146_v52, %v138_v49  ;;  %v155_v56 = vstv %s402_s7  ;;  %v158_v57 = vstv %s404_s8  ;;  %v153_v58 = vsel %vm150_vm10, %v152_v54, %v144_v51 }
  0x3d   :  { %v156_v59 = vsel %vm150_vm10, %v155_v56, %v147_v55  ;;  %vm159_vm11 = vcmp.lt.f32.partialorder %v158_v57, %v328_v0  ;;  %v161_v60 = vstv %s408_s9  ;;  %v167_v63 = vstv %s415_s11 }
  0x3e   :  { %v162_v61 = vsel %vm159_vm11, %v161_v60, %v153_v58  ;;  %v164_v62 = vstv %s410_s10  ;;  %v170_v1 = vstv %s417_s12  ;;  %vm168_vm12 = vcmp.lt.f32.partialorder %v167_v63, %v328_v0 }
  0x3f   :  { %v165_v2 = vsel %vm159_vm11, %v164_v62, %v156_v59  ;;  %v173_v3 = vstv %s235_s13  ;;  %v176_v4 = vstv %s236_s14  ;;  %v171_v5 = vsel %vm168_vm12, %v170_v1, %v162_v61 }
  0x40   :  { %v174_v6 = vsel %vm168_vm12, %v173_v3, %v165_v2  ;;  %vm177_vm13 = vcmp.lt.f32.partialorder %v176_v4, %v328_v0  ;;  %v179_v8 = vstv %s237_s15 }
  0x41   :  { %v180_v9 = vsel %vm177_vm13, %v179_v8, %v171_v5  ;;  %v182_v10 = vstv %s238_s16 }
  0x42   :  { %v183_v11 = vsel %vm177_vm13, %v182_v10, %v174_v6  ;;  %v184_v12 = vmul.f32 %v180_v9, %v328_v0 }
  0x44   :  { %v185_v13 = vadd.f32 %v184_v12, %v183_v11 }
  0x46   :  { %190 = vst.msk [vmem:[%s446_s4] sm:$0x7] %vm188_vm14, %v185_v13 }
  0x47   :  { %195 = vsyncpa [#allocation3], 1 }
  0x48   :  { %196 = vsyncpa [#allocation5], 1 }

</bundles_post_ra>
